<compile_context>
chip_gen: v7x
topology: tpu7x:2x2x1
jax: 0.10.0
libtpu: 0.0.40
codegen_flags: <defaults>
</compile_context>

<pallas_src>
import functools

import jax
import jax.numpy as jnp
from jax import lax
from jax.experimental import pallas as pl
from jax.experimental.pallas import tpu as pltpu

_INV_SQRT2 = 0.7071067811865476


def _gelu_exact(x):
    # torch.nn.GELU() default = exact erf-based GELU.
    return 0.5 * x * (1.0 + lax.erf(x * _INV_SQRT2))


# ---------------------------------------------------------------------------
# Fused kernel: linear1 -> GELU -> linear2 (tiled) -> tall @ wide (tiled)
# ---------------------------------------------------------------------------
def _fused_kernel(hidden_ref, w1_ref, b1_ref,
                  w2tall_ref, b2tall_ref, w2wide_ref, b2wide_ref,
                  out_ref, h_s, tall_s):
    """One grid step (b, i, j) writes the (TM, TN) delta tile.

    hidden_ref : (1, 1, H)            f32   hidden row b
    w1_ref     : (rank, H)            bf16  resident (lane-dense: H on lanes)
    b1_ref     : (1, rank)            f32   resident
    w2tall_ref : (rank_k, rank_r, TM) bf16  tall-weight tile i (lane-dense: TM on lanes)
    b2tall_ref : (rank_r, TM)         f32   tall-bias tile i
    w2wide_ref : (rank_k, rank_r, TN) bf16  wide-weight tile j
    b2wide_ref : (rank_r, TN)         f32   wide-bias tile j
    out_ref    : (1, TM, TN)          bf16  delta tile
    h_s        : (1, rank)            f32   scratch: GELU activations for (b, i)
    tall_s     : (rank_r, TM)         bf16  scratch: tall factor^T for out-tile i
    """
    j = pl.program_id(2)
    rank = w1_ref.shape[0]

    # ---- h and the tall factor tile: built once per (b, out-tile i) ----------
    # Gating on j == 0 (the innermost, "arbitrary" axis) is safe no matter how the
    # b / i axes are split across TensorCores: every (b, i) chunk starts at j == 0.
    @pl.when(j == 0)
    def _build_h_and_tall():
        x = hidden_ref[0].astype(jnp.bfloat16)                          # (1, H)
        h = lax.dot_general(x, w1_ref[...], (((1,), (1,)), ((), ())),
                            preferred_element_type=jnp.float32)         # (1, rank)
        h = _gelu_exact(h + b1_ref[...])                                # f32
        h_s[...] = h

        hrep = jnp.broadcast_to(h, (rank, rank))                        # rows all = h
        acc = b2tall_ref[...]                                           # (rank, TM) f32
        # rank is small (<< MXU width); unrolled VPU outer-product accumulation.
        # TODO(synk): for rank ~ 64 switch the factor builds to an MXU matmul.
        for k in range(rank):
            acc = acc + hrep[:, k:k + 1] * w2tall_ref[k].astype(jnp.float32)
        tall_s[...] = acc.astype(tall_s.dtype)

    # ---- wide factor tile j: rebuilt every step (cheap; keeps i core-parallel) --
    hrep = jnp.broadcast_to(h_s[...], (rank, rank))
    wide = b2wide_ref[...]                                              # (rank, TN) f32
    for k in range(rank):
        wide = wide + hrep[:, k:k + 1] * w2wide_ref[k].astype(jnp.float32)

    # ---- delta tile = tall_i^T @ wide_j  (MXU, bf16 in, f32 accumulate) --------
    out_ref[0] = lax.dot_general(
        tall_s[...], wide.astype(jnp.bfloat16),
        (((0,), (0,)), ((), ())),                # contract the rank dim of both
        preferred_element_type=jnp.float32).astype(out_ref.dtype)


# ---------------------------------------------------------------------------
# Wrapper
# ---------------------------------------------------------------------------
def _pick_tile(dim, preferred, quantum):
    """Largest divisor of `dim` that is <= preferred and a multiple of `quantum`;
    falls back to the full dim (full-extent blocks are always legal)."""
    if dim <= preferred:
        return dim
    best = None
    for t in range(quantum, preferred + 1, quantum):
        if dim % t == 0:
            best = t
    return best if best is not None else dim


@functools.partial(jax.jit, static_argnames=("tm", "tn", "out_dtype"))
def compression_head_forward(hidden, params, *, tm=None, tn=None,
                             out_dtype=jnp.bfloat16):
    """hidden: (B, hidden_dim) f32; params in kernel layout (see pack_params).
    Returns delta (B, target_out, target_in) in `out_dtype` (bf16 by default: the
    kernel is HBM-writeback bound, so halving output bytes is the biggest lever);
    batch dim squeezed if B == 1 (matching torch's .squeeze(0))."""
    w1, b1, w2_tall, b2_tall, w2_wide, b2_wide = params
    B, H = hidden.shape
    rank = w1.shape[0]
    target_out = b2_tall.shape[1]
    target_in = b2_wide.shape[1]

    # TM is a lane dim of the tall tiles -> quantum 128 (or full-dim fallback).
    TM = tm if tm is not None else _pick_tile(target_out, 512, 128)
    TN = tn if tn is not None else _pick_tile(target_in, 2048, 128)
    assert target_out % TM == 0 and (TM % 128 == 0 or TM == target_out)
    assert target_in % TN == 0 and (TN % 128 == 0 or TN == target_in)
    n_i = target_out // TM
    n_j = target_in // TN

    out_bytes = jnp.dtype(out_dtype).itemsize
    flops = 2 * B * (n_i * H * rank
                     + rank * rank * target_out
                     + n_i * rank * rank * target_in
                     + target_out * rank * target_in)
    bytes_accessed = (B * H * 4 + w1.size * 2 + b1.size * 4
                      + B * (w2_tall.size * 2 + b2_tall.size * 4)
                      + B * n_i * (w2_wide.size * 2 + b2_wide.size * 4)
                      + B * target_out * target_in * out_bytes)

    hidden3 = hidden.reshape(B, 1, H)

    delta = pl.pallas_call(
        _fused_kernel,
        out_shape=jax.ShapeDtypeStruct((B, target_out, target_in), out_dtype),
        grid=(B, n_i, n_j),
        in_specs=[
            pl.BlockSpec((1, 1, H), lambda b, i, j: (b, 0, 0)),            # hidden row b
            pl.BlockSpec((rank, H), lambda b, i, j: (0, 0)),               # W1 (resident)
            pl.BlockSpec((1, rank), lambda b, i, j: (0, 0)),               # b1
            pl.BlockSpec((rank, rank, TM), lambda b, i, j: (0, 0, i)),     # tall W2 tile i
            pl.BlockSpec((rank, TM), lambda b, i, j: (0, i)),              # tall b2 tile i
            pl.BlockSpec((rank, rank, TN), lambda b, i, j: (0, 0, j)),     # wide W2 tile j
            pl.BlockSpec((rank, TN), lambda b, i, j: (0, j)),              # wide b2 tile j
        ],
        out_specs=pl.BlockSpec((1, TM, TN), lambda b, i, j: (b, i, j)),
        scratch_shapes=[
            pltpu.VMEM((1, rank), jnp.float32),      # h = GELU(linear1) cache
            pltpu.VMEM((rank, TM), jnp.bfloat16),    # tall factor^T tile (out-tile i)
        ],
        compiler_params=pltpu.CompilerParams(
            # i is safely core-parallel: scratches are (re)built at j == 0 of every
            # (b, i) chunk, and the wide factor is recomputed each step.
            dimension_semantics=("parallel", "parallel", "arbitrary"),
        ),
        cost_estimate=pl.CostEstimate(flops=flops,
                                      transcendentals=B * n_i * rank,
                                      bytes_accessed=bytes_accessed),
    )(hidden3, w1, b1, w2_tall, b2_tall, w2_wide, b2_wide)

    if B == 1:  # torch: delta.squeeze(0)
        delta = delta[0]
    return delta


# ---------------------------------------------------------------------------
# Parameter packing (torch layout -> kernel layout) and synthetic init
# ---------------------------------------------------------------------------
def pack_params(w1, b1, w2, b2, *, target_in, target_out, rank):
    """torch layout:
         linear1.weight (rank, H), linear1.bias (rank,)
         linear2.weight ((out+in)*rank, rank), linear2.bias ((out+in)*rank,)
       -> kernel layout (bf16 weights, lane-dense pre-split/reshaped)."""
    w1k = jnp.asarray(w1, jnp.float32).astype(jnp.bfloat16)              # (rank, H)
    b1k = jnp.asarray(b1, jnp.float32).reshape(1, rank)
    w2t = jnp.asarray(w2, jnp.float32).T                                  # (rank_k, total)
    split = target_out * rank
    # tall: column o*rank + r  -> (k, r, o)  (lane-dense along out)
    w2_tall = (w2t[:, :split].reshape(rank, target_out, rank)
               .transpose(0, 2, 1).astype(jnp.bfloat16))                  # (rank, rank, out)
    # wide: column split + r*in + i -> (k, r, i)
    w2_wide = w2t[:, split:].reshape(rank, rank, target_in).astype(jnp.bfloat16)
    b2f = jnp.asarray(b2, jnp.float32)
    b2_tall = b2f[:split].reshape(target_out, rank).T                     # (rank, out)
    b2_wide = b2f[split:].reshape(rank, target_in)                        # (rank, in)
    return (w1k, b1k, w2_tall, b2_tall, w2_wide, b2_wide)


def init_torch_layout_params(key, hidden_dim, target_in, target_out, rank):
    total = (target_in + target_out) * rank
    k1, k2, k3, k4 = jax.random.split(key, 4)
    w1 = jax.random.normal(k1, (rank, hidden_dim), jnp.float32) * 0.05
    b1 = jax.random.normal(k2, (rank,), jnp.float32) * 0.01
    w2 = jax.random.normal(k3, (total, rank), jnp.float32) * 0.05
    b2 = jax.random.normal(k4, (total,), jnp.float32) * 0.01
    return (w1, b1, w2, b2)


# ---------------------------------------------------------------------------
# References
# ---------------------------------------------------------------------------
def _reference_f32(hidden, torch_params, *, rank, target_in, target_out):
    """Pure-f32 JAX transcription of the torch forward."""
    w1, b1, w2, b2 = torch_params
    x = hidden @ w1.T + b1
    x = _gelu_exact(x)
    x = x @ w2.T + b2
    B = hidden.shape[0]
    tall = x[:, :target_out * rank].reshape(B, target_out, rank)
    wide = x[:, target_out * rank:].reshape(B, rank, target_in)
    delta = jnp.einsum("bor,bri->boi", tall, wide)
    return delta[0] if B == 1 else delta


def _reference_mirror(hidden, packed, *, rank, target_in, target_out):
    """Reference that mirrors the kernel's bf16 cast points exactly (f32 output)."""
    w1, b1, w2_tall, b2_tall, w2_wide, b2_wide = packed
    h = lax.dot_general(hidden.astype(jnp.bfloat16), w1,
                        (((1,), (1,)), ((), ())),
                        preferred_element_type=jnp.float32) + b1          # (B, rank)
    h = _gelu_exact(h)                                                     # f32
    tallT = jnp.einsum("bk,kro->bro", h, w2_tall.astype(jnp.float32)) + b2_tall
    wide = jnp.einsum("bk,kri->bri", h, w2_wide.astype(jnp.float32)) + b2_wide
    delta = jnp.einsum("bro,bri->boi",
                       tallT.astype(jnp.bfloat16), wide.astype(jnp.bfloat16),
                       preferred_element_type=jnp.float32)
    B = hidden.shape[0]
    return delta[0] if B == 1 else delta


if __name__ == "__main__":
    # Small shapes consistent with the module; target_out/target_in big enough to
    # exercise the tiled (multi-block) code paths when explicit tile sizes are given.
    B, hidden_dim, rank = 2, 32, 8
    target_out, target_in = 256, 384

    key = jax.random.PRNGKey(0)
    kx, kp = jax.random.split(key)
    hidden = jax.random.normal(kx, (B, hidden_dim), jnp.float32)
    torch_params = init_torch_layout_params(kp, hidden_dim, target_in, target_out, rank)
    params = pack_params(*torch_params, target_in=target_in,
                         target_out=target_out, rank=rank)

    # Explicit small tiles -> grid (B, 2, 3): exercises factor caching, pl.when
    # gating and per-step wide rebuild.  Auto tiles -> single tile per batch row.
    delta_tiled = compression_head_forward(hidden, params, tm=128, tn=128)
    delta_auto = compression_head_forward(hidden, params)
    delta_tiled, delta_auto = jax.block_until_ready((delta_tiled, delta_auto))

    assert delta_tiled.shape == (B, target_out, target_in), delta_tiled.shape
    assert delta_auto.shape == (B, target_out, target_in), delta_auto.shape
    assert delta_tiled.dtype == jnp.bfloat16 and delta_auto.dtype == jnp.bfloat16

    ref_mirror = _reference_mirror(hidden, params, rank=rank,
                                   target_in=target_in, target_out=target_out)
    ref_f32 = _reference_f32(hidden, torch_params, rank=rank,
                             target_in=target_in, target_out=target_out)

    dt = delta_tiled.astype(jnp.float32)
    da = delta_auto.astype(jnp.float32)
    assert jnp.allclose(dt, ref_mirror, atol=3e-3, rtol=2e-2), \
        "kernel (explicit tiles) mismatch vs bf16-mirrored reference"
    assert jnp.allclose(da, ref_mirror, atol=3e-3, rtol=2e-2), \
        "kernel (auto tiles) mismatch vs bf16-mirrored reference"
    # Loose check vs exact f32 torch math (bf16 weights/activations/output are an
    # intentional perf-review change; f32 accumulation is kept).
    assert jnp.allclose(dt, ref_f32, atol=8e-3, rtol=5e-2), \
        "kernel drifted too far from the f32 torch reference"

    print("KERNEL_OK")
</pallas_src>

<mosaic_0001>
module attributes {stable_mosaic.version = 11 : i64} {
  func.func @_fused_kernel(%arg0: i32, %arg1: i32, %arg2: i32, %arg3: memref<1x1x32xf32, #tpu.memory_space<vmem>>, %arg4: memref<8x32xbf16, #tpu.memory_space<vmem>>, %arg5: memref<1x8xf32, #tpu.memory_space<vmem>>, %arg6: memref<8x8x128xbf16, #tpu.memory_space<vmem>>, %arg7: memref<8x128xf32, #tpu.memory_space<vmem>>, %arg8: memref<8x8x128xbf16, #tpu.memory_space<vmem>>, %arg9: memref<8x128xf32, #tpu.memory_space<vmem>>, %arg10: memref<1x128x128xbf16, #tpu.memory_space<vmem>>, %arg11: memref<1x8xf32, #tpu.memory_space<vmem>>, %arg12: memref<8x128xbf16, #tpu.memory_space<vmem>>) attributes {dimension_semantics = [#tpu.dimension_semantics<parallel>, #tpu.dimension_semantics<parallel>, #tpu.dimension_semantics<arbitrary>], iteration_bounds = array<i64: 2, 2, 3>, scalar_prefetch = 0 : i64, scratch_operands = 2 : i64, tpu.core_type = #tpu.core_type<tc>, window_params = [{transform_indices = @transform_0, window_bounds = array<i64: 1, 1, 32>}, {pipeline_mode = #tpu.pipeline_mode<synchronous>, transform_indices = @transform_1, window_bounds = array<i64: 8, 32>}, {pipeline_mode = #tpu.pipeline_mode<synchronous>, transform_indices = @transform_2, window_bounds = array<i64: 1, 8>}, {transform_indices = @transform_3, window_bounds = array<i64: 8, 8, 128>}, {transform_indices = @transform_4, window_bounds = array<i64: 8, 128>}, {transform_indices = @transform_5, window_bounds = array<i64: 8, 8, 128>}, {transform_indices = @transform_6, window_bounds = array<i64: 8, 128>}, {transform_indices = @transform_7, window_bounds = array<i64: 1, 128, 128>}]} {
    %c0_i32 = arith.constant 0 : i32
    %0 = arith.cmpi eq, %arg2, %c0_i32 : i32
    %1 = arith.extui %0 : i1 to i32
    %c0_i32_0 = arith.constant 0 : i32
    %2 = arith.cmpi ne, %1, %c0_i32_0 : i32
    scf.if %2 {
      %c0_26 = arith.constant 0 : index
      %c0_27 = arith.constant 0 : index
      %c0_28 = arith.constant 0 : index
      %70 = vector.load %arg3[%c0_26, %c0_27, %c0_28] : memref<1x1x32xf32, #tpu.memory_space<vmem>>, vector<1x1x32xf32>
      %71 = vector.shape_cast %70 : vector<1x1x32xf32> to vector<1x32xf32>
      %72 = arith.truncf %71 : vector<1x32xf32> to vector<1x32xbf16>
      %c0_29 = arith.constant 0 : index
      %c0_30 = arith.constant 0 : index
      %73 = vector.load %arg4[%c0_29, %c0_30] : memref<8x32xbf16, #tpu.memory_space<vmem>>, vector<8x32xbf16>
      %cst_31 = arith.constant dense<0.000000e+00> : vector<1x8xf32>
      %74 = tpu.matmul %72, %73, %cst_31 {dimension_numbers = #tpu.dot_dimension_numbers<[1], [1], [0], [0], [0, 0, 1, 0], [], []>} : vector<1x32xbf16>, vector<8x32xbf16>, vector<1x8xf32> -> vector<1x8xf32>
      %c0_32 = arith.constant 0 : index
      %c0_33 = arith.constant 0 : index
      %75 = vector.load %arg5[%c0_32, %c0_33] : memref<1x8xf32, #tpu.memory_space<vmem>>, vector<1x8xf32>
      %76 = arith.addf %74, %75 : vector<1x8xf32>
      %cst_34 = arith.constant 5.000000e-01 : f32
      %77 = vector.broadcast %cst_34 : f32 to vector<1x8xf32>
      %78 = arith.mulf %77, %76 : vector<1x8xf32>
      %cst_35 = arith.constant 0.707106769 : f32
      %79 = vector.broadcast %cst_35 : f32 to vector<1x8xf32>
      %80 = arith.mulf %76, %79 : vector<1x8xf32>
      %81 = math.erf %80 : vector<1x8xf32>
      %cst_36 = arith.constant 1.000000e+00 : f32
      %82 = vector.broadcast %cst_36 : f32 to vector<1x8xf32>
      %83 = arith.addf %82, %81 : vector<1x8xf32>
      %84 = arith.mulf %78, %83 : vector<1x8xf32>
      %c0_37 = arith.constant 0 : index
      %c0_38 = arith.constant 0 : index
      %85 = vector.load %arg11[%c0_37, %c0_38] : memref<1x8xf32, #tpu.memory_space<vmem>>, vector<1x8xf32>
      tpu.vector_store %arg11[%c0_37, %c0_38], %84 {strides = array<i32>} : memref<1x8xf32, #tpu.memory_space<vmem>>, vector<1x8xf32>,
      %86 = vector.shape_cast %84 : vector<1x8xf32> to vector<1x8xf32>
      %87 = vector.broadcast %86 : vector<1x8xf32> to vector<8x8xf32>
      %c0_39 = arith.constant 0 : index
      %c0_40 = arith.constant 0 : index
      %88 = vector.load %arg7[%c0_39, %c0_40] : memref<8x128xf32, #tpu.memory_space<vmem>>, vector<8x128xf32>
      %89 = vector.extract_strided_slice %87 {offsets = [0, 0], sizes = [8, 1], strides = [1, 1]} : vector<8x8xf32> to vector<8x1xf32>
      %c0_41 = arith.constant 0 : index
      %c0_42 = arith.constant 0 : index
      %c0_43 = arith.constant 0 : index
      %90 = vector.load %arg6[%c0_41, %c0_42, %c0_43] : memref<8x8x128xbf16, #tpu.memory_space<vmem>>, vector<1x8x128xbf16>
      %91 = vector.shape_cast %90 : vector<1x8x128xbf16> to vector<8x128xbf16>
      %92 = arith.extf %91 : vector<8x128xbf16> to vector<8x128xf32>
      %93 = vector.broadcast %89 : vector<8x1xf32> to vector<8x128xf32>
      %94 = arith.mulf %93, %92 : vector<8x128xf32>
      %95 = arith.addf %88, %94 : vector<8x128xf32>
      %96 = vector.extract_strided_slice %87 {offsets = [0, 1], sizes = [8, 1], strides = [1, 1]} : vector<8x8xf32> to vector<8x1xf32>
      %c1_44 = arith.constant 1 : index
      %c0_45 = arith.constant 0 : index
      %c0_46 = arith.constant 0 : index
      %97 = vector.load %arg6[%c1_44, %c0_45, %c0_46] : memref<8x8x128xbf16, #tpu.memory_space<vmem>>, vector<1x8x128xbf16>
      %98 = vector.shape_cast %97 : vector<1x8x128xbf16> to vector<8x128xbf16>
      %99 = arith.extf %98 : vector<8x128xbf16> to vector<8x128xf32>
      %100 = vector.broadcast %96 : vector<8x1xf32> to vector<8x128xf32>
      %101 = arith.mulf %100, %99 : vector<8x128xf32>
      %102 = arith.addf %95, %101 : vector<8x128xf32>
      %103 = vector.extract_strided_slice %87 {offsets = [0, 2], sizes = [8, 1], strides = [1, 1]} : vector<8x8xf32> to vector<8x1xf32>
      %c2_47 = arith.constant 2 : index
      %c0_48 = arith.constant 0 : index
      %c0_49 = arith.constant 0 : index
      %104 = vector.load %arg6[%c2_47, %c0_48, %c0_49] : memref<8x8x128xbf16, #tpu.memory_space<vmem>>, vector<1x8x128xbf16>
      %105 = vector.shape_cast %104 : vector<1x8x128xbf16> to vector<8x128xbf16>
      %106 = arith.extf %105 : vector<8x128xbf16> to vector<8x128xf32>
      %107 = vector.broadcast %103 : vector<8x1xf32> to vector<8x128xf32>
      %108 = arith.mulf %107, %106 : vector<8x128xf32>
      %109 = arith.addf %102, %108 : vector<8x128xf32>
      %110 = vector.extract_strided_slice %87 {offsets = [0, 3], sizes = [8, 1], strides = [1, 1]} : vector<8x8xf32> to vector<8x1xf32>
      %c3_50 = arith.constant 3 : index
      %c0_51 = arith.constant 0 : index
      %c0_52 = arith.constant 0 : index
      %111 = vector.load %arg6[%c3_50, %c0_51, %c0_52] : memref<8x8x128xbf16, #tpu.memory_space<vmem>>, vector<1x8x128xbf16>
      %112 = vector.shape_cast %111 : vector<1x8x128xbf16> to vector<8x128xbf16>
      %113 = arith.extf %112 : vector<8x128xbf16> to vector<8x128xf32>
      %114 = vector.broadcast %110 : vector<8x1xf32> to vector<8x128xf32>
      %115 = arith.mulf %114, %113 : vector<8x128xf32>
      %116 = arith.addf %109, %115 : vector<8x128xf32>
      %117 = vector.extract_strided_slice %87 {offsets = [0, 4], sizes = [8, 1], strides = [1, 1]} : vector<8x8xf32> to vector<8x1xf32>
      %c4_53 = arith.constant 4 : index
      %c0_54 = arith.constant 0 : index
      %c0_55 = arith.constant 0 : index
      %118 = vector.load %arg6[%c4_53, %c0_54, %c0_55] : memref<8x8x128xbf16, #tpu.memory_space<vmem>>, vector<1x8x128xbf16>
      %119 = vector.shape_cast %118 : vector<1x8x128xbf16> to vector<8x128xbf16>
      %120 = arith.extf %119 : vector<8x128xbf16> to vector<8x128xf32>
      %121 = vector.broadcast %117 : vector<8x1xf32> to vector<8x128xf32>
      %122 = arith.mulf %121, %120 : vector<8x128xf32>
      %123 = arith.addf %116, %122 : vector<8x128xf32>
      %124 = vector.extract_strided_slice %87 {offsets = [0, 5], sizes = [8, 1], strides = [1, 1]} : vector<8x8xf32> to vector<8x1xf32>
      %c5_56 = arith.constant 5 : index
      %c0_57 = arith.constant 0 : index
      %c0_58 = arith.constant 0 : index
      %125 = vector.load %arg6[%c5_56, %c0_57, %c0_58] : memref<8x8x128xbf16, #tpu.memory_space<vmem>>, vector<1x8x128xbf16>
      %126 = vector.shape_cast %125 : vector<1x8x128xbf16> to vector<8x128xbf16>
      %127 = arith.extf %126 : vector<8x128xbf16> to vector<8x128xf32>
      %128 = vector.broadcast %124 : vector<8x1xf32> to vector<8x128xf32>
      %129 = arith.mulf %128, %127 : vector<8x128xf32>
      %130 = arith.addf %123, %129 : vector<8x128xf32>
      %131 = vector.extract_strided_slice %87 {offsets = [0, 6], sizes = [8, 1], strides = [1, 1]} : vector<8x8xf32> to vector<8x1xf32>
      %c6_59 = arith.constant 6 : index
      %c0_60 = arith.constant 0 : index
      %c0_61 = arith.constant 0 : index
      %132 = vector.load %arg6[%c6_59, %c0_60, %c0_61] : memref<8x8x128xbf16, #tpu.memory_space<vmem>>, vector<1x8x128xbf16>
      %133 = vector.shape_cast %132 : vector<1x8x128xbf16> to vector<8x128xbf16>
      %134 = arith.extf %133 : vector<8x128xbf16> to vector<8x128xf32>
      %135 = vector.broadcast %131 : vector<8x1xf32> to vector<8x128xf32>
      %136 = arith.mulf %135, %134 : vector<8x128xf32>
      %137 = arith.addf %130, %136 : vector<8x128xf32>
      %138 = vector.extract_strided_slice %87 {offsets = [0, 7], sizes = [8, 1], strides = [1, 1]} : vector<8x8xf32> to vector<8x1xf32>
      %c7_62 = arith.constant 7 : index
      %c0_63 = arith.constant 0 : index
      %c0_64 = arith.constant 0 : index
      %139 = vector.load %arg6[%c7_62, %c0_63, %c0_64] : memref<8x8x128xbf16, #tpu.memory_space<vmem>>, vector<1x8x128xbf16>
      %140 = vector.shape_cast %139 : vector<1x8x128xbf16> to vector<8x128xbf16>
      %141 = arith.extf %140 : vector<8x128xbf16> to vector<8x128xf32>
      %142 = vector.broadcast %138 : vector<8x1xf32> to vector<8x128xf32>
      %143 = arith.mulf %142, %141 : vector<8x128xf32>
      %144 = arith.addf %137, %143 : vector<8x128xf32>
      %145 = arith.truncf %144 : vector<8x128xf32> to vector<8x128xbf16>
      %c0_65 = arith.constant 0 : index
      %c0_66 = arith.constant 0 : index
      %146 = vector.load %arg12[%c0_65, %c0_66] : memref<8x128xbf16, #tpu.memory_space<vmem>>, vector<8x128xbf16>
      tpu.vector_store %arg12[%c0_65, %c0_66], %145 {strides = array<i32>} : memref<8x128xbf16, #tpu.memory_space<vmem>>, vector<8x128xbf16>,
    } else {
    }
    %c0 = arith.constant 0 : index
    %c0_1 = arith.constant 0 : index
    %3 = vector.load %arg11[%c0, %c0_1] : memref<1x8xf32, #tpu.memory_space<vmem>>, vector<1x8xf32>
    %4 = vector.shape_cast %3 : vector<1x8xf32> to vector<1x8xf32>
    %5 = vector.broadcast %4 : vector<1x8xf32> to vector<8x8xf32>
    %c0_2 = arith.constant 0 : index
    %c0_3 = arith.constant 0 : index
    %6 = vector.load %arg9[%c0_2, %c0_3] : memref<8x128xf32, #tpu.memory_space<vmem>>, vector<8x128xf32>
    %7 = vector.extract_strided_slice %5 {offsets = [0, 0], sizes = [8, 1], strides = [1, 1]} : vector<8x8xf32> to vector<8x1xf32>
    %c0_4 = arith.constant 0 : index
    %c0_5 = arith.constant 0 : index
    %c0_6 = arith.constant 0 : index
    %8 = vector.load %arg8[%c0_4, %c0_5, %c0_6] : memref<8x8x128xbf16, #tpu.memory_space<vmem>>, vector<1x8x128xbf16>
    %9 = vector.shape_cast %8 : vector<1x8x128xbf16> to vector<8x128xbf16>
    %10 = arith.extf %9 : vector<8x128xbf16> to vector<8x128xf32>
    %11 = vector.broadcast %7 : vector<8x1xf32> to vector<8x128xf32>
    %12 = arith.mulf %11, %10 : vector<8x128xf32>
    %13 = arith.addf %6, %12 : vector<8x128xf32>
    %14 = vector.extract_strided_slice %5 {offsets = [0, 1], sizes = [8, 1], strides = [1, 1]} : vector<8x8xf32> to vector<8x1xf32>
    %c1 = arith.constant 1 : index
    %c0_7 = arith.constant 0 : index
    %c0_8 = arith.constant 0 : index
    %15 = vector.load %arg8[%c1, %c0_7, %c0_8] : memref<8x8x128xbf16, #tpu.memory_space<vmem>>, vector<1x8x128xbf16>
    %16 = vector.shape_cast %15 : vector<1x8x128xbf16> to vector<8x128xbf16>
    %17 = arith.extf %16 : vector<8x128xbf16> to vector<8x128xf32>
    %18 = vector.broadcast %14 : vector<8x1xf32> to vector<8x128xf32>
    %19 = arith.mulf %18, %17 : vector<8x128xf32>
    %20 = arith.addf %13, %19 : vector<8x128xf32>
    %21 = vector.extract_strided_slice %5 {offsets = [0, 2], sizes = [8, 1], strides = [1, 1]} : vector<8x8xf32> to vector<8x1xf32>
    %c2 = arith.constant 2 : index
    %c0_9 = arith.constant 0 : index
    %c0_10 = arith.constant 0 : index
    %22 = vector.load %arg8[%c2, %c0_9, %c0_10] : memref<8x8x128xbf16, #tpu.memory_space<vmem>>, vector<1x8x128xbf16>
    %23 = vector.shape_cast %22 : vector<1x8x128xbf16> to vector<8x128xbf16>
    %24 = arith.extf %23 : vector<8x128xbf16> to vector<8x128xf32>
    %25 = vector.broadcast %21 : vector<8x1xf32> to vector<8x128xf32>
    %26 = arith.mulf %25, %24 : vector<8x128xf32>
    %27 = arith.addf %20, %26 : vector<8x128xf32>
    %28 = vector.extract_strided_slice %5 {offsets = [0, 3], sizes = [8, 1], strides = [1, 1]} : vector<8x8xf32> to vector<8x1xf32>
    %c3 = arith.constant 3 : index
    %c0_11 = arith.constant 0 : index
    %c0_12 = arith.constant 0 : index
    %29 = vector.load %arg8[%c3, %c0_11, %c0_12] : memref<8x8x128xbf16, #tpu.memory_space<vmem>>, vector<1x8x128xbf16>
    %30 = vector.shape_cast %29 : vector<1x8x128xbf16> to vector<8x128xbf16>
    %31 = arith.extf %30 : vector<8x128xbf16> to vector<8x128xf32>
    %32 = vector.broadcast %28 : vector<8x1xf32> to vector<8x128xf32>
    %33 = arith.mulf %32, %31 : vector<8x128xf32>
    %34 = arith.addf %27, %33 : vector<8x128xf32>
    %35 = vector.extract_strided_slice %5 {offsets = [0, 4], sizes = [8, 1], strides = [1, 1]} : vector<8x8xf32> to vector<8x1xf32>
    %c4 = arith.constant 4 : index
    %c0_13 = arith.constant 0 : index
    %c0_14 = arith.constant 0 : index
    %36 = vector.load %arg8[%c4, %c0_13, %c0_14] : memref<8x8x128xbf16, #tpu.memory_space<vmem>>, vector<1x8x128xbf16>
    %37 = vector.shape_cast %36 : vector<1x8x128xbf16> to vector<8x128xbf16>
    %38 = arith.extf %37 : vector<8x128xbf16> to vector<8x128xf32>
    %39 = vector.broadcast %35 : vector<8x1xf32> to vector<8x128xf32>
    %40 = arith.mulf %39, %38 : vector<8x128xf32>
    %41 = arith.addf %34, %40 : vector<8x128xf32>
    %42 = vector.extract_strided_slice %5 {offsets = [0, 5], sizes = [8, 1], strides = [1, 1]} : vector<8x8xf32> to vector<8x1xf32>
    %c5 = arith.constant 5 : index
    %c0_15 = arith.constant 0 : index
    %c0_16 = arith.constant 0 : index
    %43 = vector.load %arg8[%c5, %c0_15, %c0_16] : memref<8x8x128xbf16, #tpu.memory_space<vmem>>, vector<1x8x128xbf16>
    %44 = vector.shape_cast %43 : vector<1x8x128xbf16> to vector<8x128xbf16>
    %45 = arith.extf %44 : vector<8x128xbf16> to vector<8x128xf32>
    %46 = vector.broadcast %42 : vector<8x1xf32> to vector<8x128xf32>
    %47 = arith.mulf %46, %45 : vector<8x128xf32>
    %48 = arith.addf %41, %47 : vector<8x128xf32>
    %49 = vector.extract_strided_slice %5 {offsets = [0, 6], sizes = [8, 1], strides = [1, 1]} : vector<8x8xf32> to vector<8x1xf32>
    %c6 = arith.constant 6 : index
    %c0_17 = arith.constant 0 : index
    %c0_18 = arith.constant 0 : index
    %50 = vector.load %arg8[%c6, %c0_17, %c0_18] : memref<8x8x128xbf16, #tpu.memory_space<vmem>>, vector<1x8x128xbf16>
    %51 = vector.shape_cast %50 : vector<1x8x128xbf16> to vector<8x128xbf16>
    %52 = arith.extf %51 : vector<8x128xbf16> to vector<8x128xf32>
    %53 = vector.broadcast %49 : vector<8x1xf32> to vector<8x128xf32>
    %54 = arith.mulf %53, %52 : vector<8x128xf32>
    %55 = arith.addf %48, %54 : vector<8x128xf32>
    %56 = vector.extract_strided_slice %5 {offsets = [0, 7], sizes = [8, 1], strides = [1, 1]} : vector<8x8xf32> to vector<8x1xf32>
    %c7 = arith.constant 7 : index
    %c0_19 = arith.constant 0 : index
    %c0_20 = arith.constant 0 : index
    %57 = vector.load %arg8[%c7, %c0_19, %c0_20] : memref<8x8x128xbf16, #tpu.memory_space<vmem>>, vector<1x8x128xbf16>
    %58 = vector.shape_cast %57 : vector<1x8x128xbf16> to vector<8x128xbf16>
    %59 = arith.extf %58 : vector<8x128xbf16> to vector<8x128xf32>
    %60 = vector.broadcast %56 : vector<8x1xf32> to vector<8x128xf32>
    %61 = arith.mulf %60, %59 : vector<8x128xf32>
    %62 = arith.addf %55, %61 : vector<8x128xf32>
    %c0_21 = arith.constant 0 : index
    %c0_22 = arith.constant 0 : index
    %63 = vector.load %arg12[%c0_21, %c0_22] : memref<8x128xbf16, #tpu.memory_space<vmem>>, vector<8x128xbf16>
    %64 = arith.truncf %62 : vector<8x128xf32> to vector<8x128xbf16>
    %cst = arith.constant dense<0.000000e+00> : vector<128x128xf32>
    %65 = tpu.matmul %63, %64, %cst {dimension_numbers = #tpu.dot_dimension_numbers<[0], [0], [1], [1], [0, 1, 1, 1], [], []>} : vector<8x128xbf16>, vector<8x128xbf16>, vector<128x128xf32> -> vector<128x128xf32>
    %66 = arith.truncf %65 : vector<128x128xf32> to vector<128x128xbf16>
    %c0_23 = arith.constant 0 : index
    %c0_24 = arith.constant 0 : index
    %c0_25 = arith.constant 0 : index
    %67 = vector.load %arg10[%c0_23, %c0_24, %c0_25] : memref<1x128x128xbf16, #tpu.memory_space<vmem>>, vector<1x128x128xbf16>
    %68 = vector.shape_cast %67 : vector<1x128x128xbf16> to vector<128x128xbf16>
    %69 = vector.shape_cast %66 : vector<128x128xbf16> to vector<1x128x128xbf16>
    tpu.vector_store %arg10[%c0_23, %c0_24, %c0_25], %69 {strides = array<i32>} : memref<1x128x128xbf16, #tpu.memory_space<vmem>>, vector<1x128x128xbf16>,
    return
  }
  func.func @transform_0(%arg0: i32, %arg1: i32, %arg2: i32) -> (i32, i32, i32) {
    %c0_i32 = arith.constant 0 : i32
    %c0_i32_0 = arith.constant 0 : i32
    %c0_i32_1 = arith.constant 0 : i32
    return %arg0, %c0_i32, %c0_i32_0 : i32, i32, i32
  }
  func.func @transform_1(%arg0: i32, %arg1: i32, %arg2: i32) -> (i32, i32) {
    %c0_i32 = arith.constant 0 : i32
    %c0_i32_0 = arith.constant 0 : i32
    %c0_i32_1 = arith.constant 0 : i32
    return %c0_i32, %c0_i32_0 : i32, i32
  }
  func.func @transform_2(%arg0: i32, %arg1: i32, %arg2: i32) -> (i32, i32) {
    %c0_i32 = arith.constant 0 : i32
    %c0_i32_0 = arith.constant 0 : i32
    %c0_i32_1 = arith.constant 0 : i32
    return %c0_i32, %c0_i32_0 : i32, i32
  }
  func.func @transform_3(%arg0: i32, %arg1: i32, %arg2: i32) -> (i32, i32, i32) {
    %c0_i32 = arith.constant 0 : i32
    %c0_i32_0 = arith.constant 0 : i32
    %c0_i32_1 = arith.constant 0 : i32
    return %c0_i32, %c0_i32_0, %arg1 : i32, i32, i32
  }
  func.func @transform_4(%arg0: i32, %arg1: i32, %arg2: i32) -> (i32, i32) {
    %c0_i32 = arith.constant 0 : i32
    %c0_i32_0 = arith.constant 0 : i32
    return %c0_i32, %arg1 : i32, i32
  }
  func.func @transform_5(%arg0: i32, %arg1: i32, %arg2: i32) -> (i32, i32, i32) {
    %c0_i32 = arith.constant 0 : i32
    %c0_i32_0 = arith.constant 0 : i32
    %c0_i32_1 = arith.constant 0 : i32
    return %c0_i32, %c0_i32_0, %arg2 : i32, i32, i32
  }
  func.func @transform_6(%arg0: i32, %arg1: i32, %arg2: i32) -> (i32, i32) {
    %c0_i32 = arith.constant 0 : i32
    %c0_i32_0 = arith.constant 0 : i32
    return %c0_i32, %arg2 : i32, i32
  }
  func.func @transform_7(%arg0: i32, %arg1: i32, %arg2: i32) -> (i32, i32, i32) {
    %c0_i32 = arith.constant 0 : i32
    return %arg0, %arg1, %arg2 : i32, i32, i32
  }
}

</mosaic_0001>

<bundles_post_ra>
// kernel: compression_head_forward.1
= control target key start
LH: loop header
LB: loop body
LE: loop exit
PB: predicated region body
PF: predicated region fallthrough
CT: control target
= control target key end

     0   :  { %s2378_s0 = inlined_call_operand.vmem [shape: f32[2,1,32], index: 0, kind: input, shape index: {}]   ;;  %s2379_s1 = inlined_call_operand.hbm [shape: bf16[8,32], index: 1, kind: input, shape index: {}]   ;;  %s2380_s2 = inlined_call_operand.hbm [shape: f32[1,8], index: 2, kind: input, shape index: {}]   ;;  %s2381_s3 = inlined_call_operand.hbm [shape: bf16[8,8,256], index: 3, kind: input, shape index: {}]   ;;  %s2382_s4 = inlined_call_operand.hbm [shape: f32[8,256], index: 4, kind: input, shape index: {}]   ;;  %s2383_s5 = inlined_call_operand.hbm [shape: bf16[8,8,384], index: 5, kind: input, shape index: {}]   ;;  %s2384_s6 = inlined_call_operand.vmem [shape: f32[8,384], index: 6, kind: input, shape index: {}]   ;;  %s2385_s7 = inlined_call_operand.hbm [shape: bf16[2,256,384], index: 7, kind: output, shape index: {}]  }
   0x1   :  { %2413 = sst [smem:[#allocation29_spill]] %s2378_s0 }
   0x2   :  { %2414 = sst [smem:[#allocation30_spill]] %s2379_s1 }
   0x3   :  { %2415 = sst [smem:[#allocation31_spill]] %s2380_s2 }
   0x4   :  { %2416 = sst [smem:[#allocation32_spill]] %s2381_s3 }
   0x5   :  { %2417 = sst [smem:[#allocation33_spill]] %s2382_s4 }
   0x6   :  { %2418 = sst [smem:[#allocation34_spill]] %s2383_s5 }
   0x7   :  { %2419 = sst [smem:[#allocation35_spill]] %s2384_s6 }
   0x8   :  { %2420 = sst [smem:[#allocation36_spill]] %s2385_s7 }
   0x9   :  { %12 = vsyncpa [#allocation5], 0 }
   0xa   :  { %13 = vsyncpa [#allocation8], 0 }
   0xb   :  { %14 = vsyncpa [#allocation6], 0 }
   0xc   :  { %16 = vsyncpa [#allocation6 + $0x1], 0  ;;  %s1869_s24 = smov 0   ;;  %s1871_s25 = smov 0  }
   0xd   :  { %s1873_s26 = smov 0   ;;  %s1875_s27 = smov 0  }
   0xe   :  { %s1877_s28 = smov 0   ;;  %s1879_s29 = smov 0  }
   0xf   :  { %s1881_s30 = smov 0   ;;  %s1883_s8 = smov 0  }
  0x10   :  { %s1885_s9 = smov 0   ;;  %s1887_s10 = smov 0  }
  0x11   :  { %s1889_s11 = smov 0   ;;  %s1891_s12 = smov 0  }
  0x12   :  { %s1893_s13 = smov 0   ;;  %s1895_s14 = smov 0  }
  0x13   :  { %s1897_s15 = smov 0   ;;  %s1899_s16 = smov 0  }
  0x14 LB: > { %2421 = sst [smem:[#allocation18_spill]] %s1737_s24  ;;  %s1946_s17 = sadd.s32 4294967295, %s1797_s16   ;;  %s1797_s16 = sphi %s1899_s16, %s2502_s16   ;;  %s1793_s15 = sphi %s1897_s15, %s2501_s15   ;;  %s1789_s14 = sphi %s1895_s14, %s2500_s14   ;;  %s1785_s13 = sphi %s1893_s13, %s2499_s13   ;;  %s1781_s12 = sphi %s1891_s12, %s2498_s12   ;;  %s1777_s11 = sphi %s1889_s11, %s2497_s11   ;;  %s1773_s10 = sphi %s1887_s10, %s2496_s10   ;;  %s1769_s9 = sphi %s1885_s9, %s2495_s9   ;;  %s1765_s8 = sphi %s1883_s8, %s2494_s8   ;;  %s1761_s30 = sphi %s1881_s30, %s2493_s30   ;;  %s1757_s29 = sphi %s1879_s29, %s2492_s29   ;;  %s1753_s28 = sphi %s1877_s28, %s2491_s28   ;;  %s1749_s27 = sphi %s1875_s27, %s2490_s27   ;;  %s1745_s26 = sphi %s1873_s26, %s2489_s26   ;;  %s1741_s25 = sphi %s1871_s25, %s2488_s25   ;;  %s1737_s24 = sphi %s1869_s24, %s2484_s24  }
  0x15   : > { %2422 = sst [smem:[#allocation19_spill]] %s1741_s25  ;;  %s1083_s18 = sadd.s32 4294967294, %s1797_s16  }
  0x16   : > { %2423 = sst [smem:[#allocation20_spill]] %s1773_s10  ;;  %p123_p0 = scmp.ne.s32.totalorder %s1769_s9, %s1765_s8 }
  0x17   : > { %2424 = sst [smem:[#allocation21_spill]] %s1777_s11  ;;  %p124_p1 = scmp.eq.s32.totalorder %s1797_s16, 0 }
  0x18   : > { %2425 = sst [smem:[#allocation22_spill]] %s1781_s12  ;;  %p129_p2 = scmp.ne.s32.totalorder %s1765_s8, %s1761_s30 }
  0x19   : > { %2426 = sst [smem:[#allocation23_spill]] %s1797_s16  ;;  %p2387_p3 = scmp.eq.s32.totalorder %s1946_s17, 0 }
  0x1a   : > { %p175_p4 = scmp.ne.s32.totalorder %s1757_s29, %s1753_s28  ;;  %p181_p6 = scmp.ne.s32.totalorder %s1753_s28, %s1749_s27 }
  0x1b   : > { %p1960_p5 = por %p2387_p3, %p129_p2  ;;  %p1965_p7 = por %p124_p1, %p123_p0 }
  0x1c   : > { %p1969_p8 = por %p175_p4, %p124_p1  ;;  %p1975_p9 = por %p181_p6, %p2387_p3 }
  0x1d   : > { %s2427_s21 = scalar_select %p1960_p5, 1, 0 }
  0x1e   : > { %s2430_s30 = scalar_select %p1975_p9, 1, 0 }
  0x1f   : > { %p234_p10 = scmp.ne.s32.totalorder %s1745_s26, %s1741_s25  ;;  %p235_p11 = scmp.eq.s32.totalorder %s1946_s17, 11 }
  0x20   : > { %2431 = sst [smem:[#allocation24_spill]] %s2430_s30  ;;  %p240_p12 = scmp.ne.s32.totalorder %s1741_s25, %s1737_s24 }
  0x21   : > { %p241_p13 = scmp.eq.s32.totalorder %s1083_s18, 11  ;;  %p1084_p0 = scmp.ge.s32.totalorder %s1797_s16, 1 }
  0x22   : > { %p1985_p2 = por %p235_p11, %p234_p10  ;;  %p248_p1 = scmp.lt.s32.totalorder %s1797_s16, 13 }
  0x23   : > { %p1990_p4 = por %p241_p13, %p240_p12  ;;  %s1799_s7 = smov [#allocation4]  }
  0x24   : > { %s2432_s27 = scalar_select %p1985_p2, 1, 0 }
  0x25   : > { %s2434_s19 = scalar_select %p1990_p4, 1, 0 }
  0x26   : > { %2433 = sst [smem:[#allocation25_spill]] %s2432_s27  ;;  %p1994_p6 = pnand %p1084_p0, %p248_p1 }
  0x27   : > { %2435 = sst [smem:[#allocation26_spill]] %s2434_s19  ;;  %s261_s11 = sshll.u32 %s1799_s7, 4  ;;  %s262_s11 = int_to_ptr.vmem [resolvable:$true] %s261_s11 }
  0x28   : > { %s2436_s20 = scalar_select %p1994_p6, 1, 0 }
  0x29   : > { %p1285_p3 = pneg %p1994_p6  ;;  %p1308_p9 = scmp.lt.s32.totalorder %s1797_s16, 12 }
  0x2a   : > { %p2437_p10 = scmp.eq.s32.totalorder %s1946_s17, 0  ;;  %s289_s7 = sand.u32 1, %s1797_s16  }
  0x2b   : > { %p2009_p12 = pnand %p1308_p9, %p1965_p7  ;;  %p2015_p13 = pnand %p1308_p9, %p1969_p8 }
  0x2c   : > { %p2003_p11 = pnand %p1285_p3, %p2437_p10  ;;  %s2441_s1 = sld [smem:[#allocation30_spill]] }
  0x2d   : > { %s2439_s19 = scalar_select %p2009_p12, 1, 0 }
  0x2e   : > { %s2438_s18 = scalar_select %p2003_p11, 1, 0 }
  0x2f   : > { %s2440_s24 = scalar_select %p2015_p13, 1, 0 }
  0x30   : > { %p2406_p0 = pneg %p2003_p11 }
  0x32   : > { %s1477_s0 = scalar_lea.hbm %s2441_s1, 64 }
  0x33   : > { %p1478_p3 = scmp.ne.s32.totalorder %s2441_s1, %s1477_s0  ;;  %p1484_p8 = scmp.lt.u32.totalorder %s1477_s0, %s2441_s1 }
  0x35   : > { %p1480_p7 = pnand %p2406_p0, %p1478_p3 }
  0x37   : > { %p1481_p1 = pneg %p1480_p7 }
  0x39   : > { %p1486_p9 = pnand %p1484_p8, %p1481_p1 }
  0x3b   : > { %1489 = shalt.err (!%p1486_p9)
}
  0x3c   : > { %s1490_s16 = scalar_lea.vmem %s262_s11, 64  ;;  %p1498_p5 = scmp.lt.s32.totalorder %s262_s11, %s262_s11 }
  0x3d   : > { %p1491_p10 = scmp.ne.s32.totalorder %s262_s11, %s1490_s16  ;;  %p1499_p6 = scmp.lt.s32.totalorder %s1490_s16, %s1490_s16 }
  0x3f   : > { %p1493_p4 = pnand %p1491_p10, %p2406_p0  ;;  %p1500_p13 = por %p1499_p6, %p1498_p5 }
  0x41   : > { %p1494_p2 = pneg %p1493_p4 }
  0x43   : > { %p1501_p12 = pnand %p1500_p13, %p1494_p2 }
  0x45   : > { %1504 = shalt.err (!%p1501_p12)
}
  0x46   : > { %1288 = dma.hbm_to_vmem [thread:$0]  (!%p2003_p11), %s2441_s1, 64, %s262_s11, [#allocation5]  }
  0x47   : > { %s291_s0 = sand.u32 1, %s1769_s9   ;;  %s1089_s27 = sshll.u32 %s1789_s14, 6 }
  0x48   : > { %s1088_s12 = sshll.u32 %s291_s0, 5  ;;  %s2442_s3 = sld [smem:[#allocation32_spill]] }
  0x49   : > { %s293_s25 = scalar_lea.vmem [#allocation9], %s1088_s12  ;;  %s2051_s6 = sshll.u32 %s291_s0, 3 }
  0x4a   : > { %s299_s30 = sshll.u32 %s293_s25, 4  ;;  %s2053_s10 = scalar_lea.sflag [#allocation5], %s289_s7  ;;  %s2049_s30 = int_to_ptr.vmem [resolvable:$true] %s299_s30 }
  0x4b   : > { %p2443_p2 = scmp.ne.s32.totalorder %s2439_s19, 0 }
  0x4d   : > { %p1507_p4 = pneg %p2443_p2 }
  0x4e   : > { %s2047_s16 = scalar_lea.hbm %s2442_s3, %s1089_s27  ;;  %s1510_s23 = scalar_lea.hbm %s2442_s3, 1024 }
  0x4f   : > { %s1505_s11 = scalar_lea.hbm %s2047_s16, 512  ;;  %p1511_p13 = scmp.lt.u32.totalorder %s2047_s16, %s2442_s3 }
  0x50   : > { %p1506_p5 = scmp.ne.s32.totalorder %s2047_s16, %s1505_s11  ;;  %p1512_p3 = scmp.lt.u32.totalorder %s1510_s23, %s1505_s11 }
  0x51   : > { %p1514_p1 = scmp.lt.u32.totalorder %s1505_s11, %s2047_s16 }
  0x52   : > { %p1508_p6 = pnand %p1507_p4, %p1506_p5  ;;  %p1513_p7 = por %p1512_p3, %p1511_p13 }
  0x54   : > { %p1509_p12 = pneg %p1508_p6  ;;  %p1515_p8 = por %p1514_p1, %p1513_p7 }
  0x56   : > { %p1516_p9 = pnand %p1515_p8, %p1509_p12 }
  0x58   : > { %1519 = shalt.err (!%p1516_p9)
}
  0x59   : > { %s1520_s7 = scalar_lea.vmem %s2049_s30, 512  ;;  %s1800_s0 = smov [#allocation9]  }
  0x5a   : > { %p1521_p10 = scmp.ne.s32.totalorder %s2049_s30, %s1520_s7  ;;  %s1525_s27 = sshll.u32 %s1800_s0, 4  ;;  %s1526_s27 = int_to_ptr.vmem [resolvable:$false] %s1525_s27 }
  0x5b   : > { %s1527_s22 = scalar_lea.vmem %s1526_s27, 1024  ;;  %p1528_p0 = scmp.lt.s32.totalorder %s2049_s30, %s1526_s27 }
  0x5c   : > { %p1523_p5 = pnand %p1521_p10, %p1507_p4  ;;  %p1529_p13 = scmp.lt.s32.totalorder %s1527_s22, %s1520_s7 }
  0x5e   : > { %p1524_p6 = pneg %p1523_p5  ;;  %p1530_p3 = por %p1529_p13, %p1528_p0 }
  0x60   : > { %p1531_p7 = pnand %p1530_p3, %p1524_p6 }
  0x62   : > { %1534 = shalt.err (!%p1531_p7)
}
  0x63   : > { %s1801_s11 = smov 128   ;;  %s2409_s23 = smov 64  }
  0x64   : > { %s2410_s12 = smov 4   ;;  %s1091_s25 = sshll.u32 %s1789_s14, 7 }
  0x65   : > { %1295 = dma.hbm_to_vmem [thread:$0]  (!%p2443_p2), %s2047_s16, 512, %s2049_s30, %s2053_s10, %s1801_s11, %s2409_s23, %s2410_s12  }
  0x66   : > { %s2444_s4 = sld [smem:[#allocation33_spill]]  ;;  %s313_s22 = scalar_lea.vmem [#allocation10], %s2051_s6 }
  0x67   : > { %s320_s1 = sshll.u32 %s313_s22, 4  ;;  %s321_s1 = int_to_ptr.vmem [resolvable:$true] %s320_s1 }
  0x6c   : > { %s2087_s27 = scalar_lea.hbm %s2444_s4, %s1091_s25  ;;  %s1540_s11 = scalar_lea.hbm %s2444_s4, 256 }
  0x6d   : > { %s1535_s3 = scalar_lea.hbm %s2087_s27, 128  ;;  %p1541_p8 = scmp.lt.u32.totalorder %s2087_s27, %s2444_s4 }
  0x6e   : > { %p1536_p0 = scmp.ne.s32.totalorder %s2087_s27, %s1535_s3  ;;  %p1542_p9 = scmp.lt.u32.totalorder %s1540_s11, %s1535_s3 }
  0x6f   : > { %p1544_p5 = scmp.lt.u32.totalorder %s1535_s3, %s2087_s27 }
  0x70   : > { %p1538_p12 = pnand %p1536_p0, %p1507_p4  ;;  %p1543_p10 = por %p1542_p9, %p1541_p8 }
  0x72   : > { %p1539_p1 = pneg %p1538_p12  ;;  %p1545_p6 = por %p1544_p5, %p1543_p10 }
  0x74   : > { %p1546_p13 = pnand %p1545_p6, %p1539_p1 }
  0x76   : > { %1549 = shalt.err (!%p1546_p13)
}
  0x77   : > { %s1550_s6 = scalar_lea.vmem %s321_s1, 128  ;;  %s1804_s7 = smov [#allocation10]  }
  0x78   : > { %p1551_p3 = scmp.ne.s32.totalorder %s321_s1, %s1550_s6  ;;  %s1555_s22 = sshll.u32 %s1804_s7, 4  ;;  %s1556_s22 = int_to_ptr.vmem [resolvable:$false] %s1555_s22 }
  0x79   : > { %s1557_s30 = scalar_lea.vmem %s1556_s22, 256  ;;  %p1558_p12 = scmp.lt.s32.totalorder %s321_s1, %s1556_s22 }
  0x7a   : > { %p1553_p7 = pnand %p1551_p3, %p1507_p4  ;;  %p1559_p11 = scmp.lt.s32.totalorder %s1557_s30, %s1550_s6 }
  0x7c   : > { %p1554_p0 = pneg %p1553_p7  ;;  %p1560_p8 = por %p1559_p11, %p1558_p12 }
  0x7e   : > { %p1561_p9 = pnand %p1560_p8, %p1554_p0 }
  0x80   : > { %1564 = shalt.err (!%p1561_p9)
}
  0x81   : > { %1298 = dma.hbm_to_vmem [thread:$0]  (!%p2443_p2), %s2087_s27, 128, %s321_s1, %s2053_s10  }
  0x82   : > { %s1805_s3 = smov [#allocation7]   ;;  %s2445_s2 = sld [smem:[#allocation31_spill]] }
  0x83   : > { %s272_s16 = sshll.u32 %s1805_s3, 4  ;;  %p2446_p11 = scmp.ne.s32.totalorder %s2438_s18, 0  ;;  %s273_s16 = int_to_ptr.vmem [resolvable:$true] %s272_s16 }
  0x85   : > { %p2447_p1 = pneg %p2446_p11 }
  0x88   : > { %s1565_s25 = scalar_lea.hbm %s2445_s2, 16 }
  0x89   : > { %p1566_p4 = scmp.ne.s32.totalorder %s2445_s2, %s1565_s25  ;;  %p1572_p6 = scmp.lt.u32.totalorder %s1565_s25, %s2445_s2 }
  0x8b   : > { %p1568_p10 = pnand %p1566_p4, %p2447_p1 }
  0x8d   : > { %p1569_p5 = pneg %p1568_p10 }
  0x8f   : > { %p1574_p2 = pnand %p1572_p6, %p1569_p5 }
  0x91   : > { %1577 = shalt.err (!%p1574_p2)
}
  0x92   : > { %s1578_s1 = scalar_lea.vmem %s273_s16, 16  ;;  %p2448_p3 = pmov %p2447_p1 }
  0x93   : > { %p1579_p13 = scmp.ne.s32.totalorder %s273_s16, %s1578_s1  ;;  %s1585_s27 = scalar_lea.vmem %s273_s16, 32 }
  0x94   : > { %p1586_p12 = scmp.lt.s32.totalorder %s273_s16, %s273_s16  ;;  %p1587_p8 = scmp.lt.s32.totalorder %s1585_s27, %s1578_s1 }
  0x95   : > { %p1581_p7 = pnand %p1579_p13, %p2448_p3 }
  0x96   : > { %p1588_p9 = por %p1587_p8, %p1586_p12 }
  0x97   : > { %p1582_p0 = pneg %p1581_p7 }
  0x99   : > { %p1589_p1 = pnand %p1588_p9, %p1582_p0 }
  0x9b   : > { %1592 = shalt.err (!%p1589_p1)
}
  0x9c   : > { %1291 = dma.hbm_to_vmem [thread:$0]  (!%p2446_p11), %s2445_s2, 16, %s273_s16, [#allocation8]  }
  0x9d   : > { %s34_s30 = sadd.s32 1, %s1785_s13  ;;  %s37_s3 = sadd.s32 1, %s1789_s14 }
  0x9e   : > { %p35_p4 = scmp.ge.s32.totalorder %s34_s30, 3  ;;  %s41_s11 = sadd.s32 1, %s1793_s15 }
  0x9f   : > { %s329_s0 = sand.u32 1, %s1757_s29   ;;  %s1093_s18 = sshll.u32 %s1785_s13, 6 }
  0xa0   : > { %s2504_s30 = smov (%p35_p4, %s34_s30), 0  ;;  %s2506_s3 = smov (!%p35_p4, %s37_s3), %s1789_s14 }
  0xa1   : > { %s165_s25 = ssub.s32 %s1785_s13, %s2504_s30  ;;  %s1092_s7 = sshll.u32 %s329_s0, 5 }
  0xa2   : > { %p39_p10 = scmp.ge.s32.totalorder %s2506_s3, 2  ;;  %p166_p11 = scmp.eq.s32.totalorder %s165_s25, 0 }
  0xa3   : > { %s2449_s5 = sld [smem:[#allocation34_spill]]  ;;  %s331_s27 = scalar_lea.vmem [#allocation11], %s1092_s7 }
  0xa4   : > { %s2508_s3 = smov (%p39_p10, %s2506_s3), 0  ;;  %s2510_s11 = smov (!%p39_p10, %s41_s11), %s1793_s15 }
  0xa5   : > { %2450 = sst [smem:[#allocation27_spill]] %s2508_s3  ;;  %s113_s1 = ssub.s32 %s1789_s14, %s2508_s3 }
  0xa6   : > { %s337_s23 = sshll.u32 %s331_s27, 4  ;;  %p43_p5 = scmp.ge.s32.totalorder %s2510_s11, 2  ;;  %s2164_s23 = int_to_ptr.vmem [resolvable:$true] %s337_s23 }
  0xa7   : > { %p114_p6 = scmp.eq.s32.totalorder %s113_s1, 0  ;;  %s2451_s22 = sadd.s32 1, %s1757_s29 }
  0xa8   : > { %s2153_s0 = scalar_select %p166_p11, %s1757_s29, %s2451_s22  }
  0xa9   : > { %s2143_s6 = scalar_lea.hbm %s2449_s5, %s1093_s18  ;;  %s2512_s11 = smov (%p43_p5, %s2510_s11), 0 }
  0xaa   : > { %2452 = sst [smem:[#allocation28_spill]] %s2512_s11  ;;  %s2453_s18 = sadd.s32 1, %s1769_s9 }
  0xab   : > { %s2160_s16 = scalar_select %p114_p6, %s1769_s9, %s2453_s18  }
  0xac   : > { %s217_s19 = ssub.s32 %s1793_s15, %s2512_s11  ;;  %s224_s7 = sadd.s32 1, %s1745_s26 }
  0xad   : > { %s219_s12 = sor.u32 %s217_s19, %s113_s1  ;;  %s1593_s4 = scalar_lea.hbm %s2143_s6, 512 }
  0xae   : > { %s221_s2 = sor.u32 %s219_s12, %s165_s25  ;;  %p1594_p13 = scmp.ne.s32.totalorder %s2143_s6, %s1593_s4 }
  0xaf   : > { %p2167_p2 = scmp.eq.s32.totalorder %s221_s2, 0  ;;  %p2455_p3 = scmp.ne.s32.totalorder %s2440_s24, 0 }
  0xb0   : > { %s1598_s11 = scalar_lea.hbm %s2449_s5, 1536  ;;  %p1599_p8 = scmp.lt.u32.totalorder %s2143_s6, %s2449_s5 }
  0xb1   : > { %p1595_p7 = pneg %p2455_p3  ;;  %p1600_p9 = scmp.lt.u32.totalorder %s1598_s11, %s1593_s4 }
  0xb2   : > { %p1602_p4 = scmp.lt.u32.totalorder %s1593_s4, %s2143_s6 }
  0xb3   : > { %p1596_p0 = pnand %p1595_p7, %p1594_p13  ;;  %p1601_p1 = por %p1600_p9, %p1599_p8 }
  0xb5   : > { %p1597_p12 = pneg %p1596_p0  ;;  %p1603_p10 = por %p1602_p4, %p1601_p1 }
  0xb7   : > { %p1604_p11 = pnand %p1603_p10, %p1597_p12 }
  0xb9   : > { %1607 = shalt.err (!%p1604_p11)
}
  0xba   : > { %s1608_s2 = scalar_lea.vmem %s2164_s23, 512  ;;  %s1806_s12 = smov [#allocation11]  }
  0xbb   : > { %p1609_p5 = scmp.ne.s32.totalorder %s2164_s23, %s1608_s2  ;;  %s1613_s25 = sshll.u32 %s1806_s12, 4  ;;  %s1614_s25 = int_to_ptr.vmem [resolvable:$false] %s1613_s25 }
  0xbc   : > { %s1615_s3 = scalar_lea.vmem %s1614_s25, 1024  ;;  %p1616_p0 = scmp.lt.s32.totalorder %s2164_s23, %s1614_s25 }
  0xbd   : > { %p1611_p6 = pnand %p1609_p5, %p1595_p7  ;;  %p1617_p8 = scmp.lt.s32.totalorder %s1615_s3, %s1608_s2 }
  0xbf   : > { %p1612_p13 = pneg %p1611_p6  ;;  %p1618_p9 = por %p1617_p8, %p1616_p0 }
  0xc1   : > { %p1619_p1 = pnand %p1618_p9, %p1612_p13 }
  0xc3   : > { %1622 = shalt.err (!%p1619_p1)
}
  0xc4   : > { %s1807_s4 = smov 192   ;;  %s2456_s11 = smov 4  }
  0xc5   : > { %s2457_s19 = smov 64   ;;  %p2458_p7 = scmp.ne.s32.totalorder %s2436_s20, 0 }
  0xc6   : > { %1301 = dma.hbm_to_vmem [thread:$0]  (!%p2455_p3), %s2143_s6, 512, %s2164_s23, %s2053_s10, %s1807_s4, %s2457_s19, %s2456_s11  }
  0xc7   : > { %s2204_s22 = scalar_select %p2167_p2, %s1745_s26, %s224_s7  }
  0xc8   : > { %356 = sbr.rel (%p2458_p7) target bundleno = 1070 (0x42e), region = 48  ;;  %p2459_p12 = scmp.eq.s32.totalorder (!%p2458_p7), %s1946_s17, 0 }
  0xcf   : > { %1716 = dma.done.wait (%p2459_p12), [#allocation5], 64   ;;  %p2460_p4 = pmov %p2459_p12 }
  0xd1   : > { %1718 = vsyncadd (%p2460_p4), [#allocation5], 4294967232  ;;  %p2461_p10 = pmov %p2460_p4 }
  0xd2   : > { %p2462_p11 = pmov %p2460_p4 }
  0xd3   : > { %1720 = dma.done.wait (%p2461_p10), [#allocation8], 16  }
  0xd4   : > { %1722 = vsyncadd (%p2462_p11), [#allocation8], 4294967280  ;;  %s366_s24 = sand.u32 1, %s1946_s17   ;;  %s368_s10 = sand.u32 1, %s1765_s8  }
  0xd5   : > { %s1097_s6 = sshll.u32 %s368_s10, 5  ;;  %s367_s20 = scalar_lea.sflag [#allocation5], %s366_s24 }
  0xd6   : > { %s2218_s23 = scalar_lea.vmem [#allocation9], %s1097_s6  ;;  %p2463_p2 = scmp.ne.s32.totalorder %s2427_s21, 0 }
  0xd8   : > { %1724 = dma.done.wait (%p2463_p2), %s367_s20, 640  }
  0xd9   : > { %1726 = vsyncadd (%p2463_p2), %s367_s20, 4294966656  ;;  %s2464_s7 = sld [smem:[#allocation24_spill]]  ;;  %s2224_s27 = sshll.u32 %s368_s10, 3 }
  0xda   : > { %s386_s18 = sand.u32 1, %s1753_s28  }
  0xdb   : > { %s1099_s1 = sshll.u32 %s386_s18, 5 }
  0xdc   : > { %s2228_s12 = scalar_lea.vmem [#allocation11], %s1099_s1 }
  0xdf   : > { %p2465_p3 = scmp.ne.s32.totalorder %s2464_s7, 0 }
  0xe1   : > { %1728 = dma.done.wait (%p2465_p3), %s367_s20, 512  }
  0xe2   : > { %1730 = vsyncadd (%p2465_p3), %s367_s20, 4294966784  ;;  %s2466_s17 = sld [smem:[#allocation19_spill]]  ;;  %s2467_s25 = sld [smem:[#allocation22_spill]] }
  0xe3   : > { %s2468_s21 = sld [smem:[#allocation20_spill]]  ;;  %s2469_s10 = sld [smem:[#allocation29_spill]] }
  0xe4   : > { %s2470_s1 = sld [smem:[#allocation35_spill]] }
  0xe8   : > { %s433_s3 = sand.u32 1, %s2466_s17   ;;  %p436_p5 = scmp.lt.s32.totalorder %s2467_s25, 1 }
  0xe9   : > { %s1100_s4 = sshll.u32 %s433_s3, 6  ;;  %p439_p6 = scmp.lt.s32.totalorder %s2468_s21, 2 }
  0xea   : > { %s2514_s25 = smov (!%p436_p5, %s2467_s25), 1  ;;  %s2249_s5 = scalar_lea.vmem [#allocation12], %s1100_s4 }
  0xeb   : > { %s440_s11 = scalar_select %p439_p6, %s2468_s21, 2 }
  0xec   : > { %s438_s6 = scalar_lea.vmem %s2469_s10, %s2514_s25  ;;  %p1102_p13 = scmp.ne.s32.totalorder %s2468_s21, 0 }
  0xed   : > { %s1101_s18 = sshll.u32 %s440_s11, 3  ;;  %v451_v0 = vld [vmem:[#allocation4] sm:$0xf] (!%p1102_p13)  ;;  %vm453_vm0 = vcmask (!%p1102_p13), 261120   ;;  %v1808_v1 = vmov (!%p1102_p13), 0.0   ;;  %vm1809_vm1 = vmmov (!%p1102_p13), 0  }
  0xee   : > { %s2247_s2 = scalar_lea.vmem %s2470_s1, %s1101_s18  ;;  %448 = sbr.rel (%p1102_p13) target bundleno = 664 (0x298), region = 72  ;;  %1223 = vmatprep.subr.bf16.mxu0 (!%p1102_p13), %v1808_v1  ;;  %v458_v2 = vsel (!%p1102_p13), %vm453_vm0, %v451_v0, 0  ;;  %1225 = vmatprep.mubr.msk.bf16.mxu0 (!%p1102_p13), %vm1809_vm1, %v1808_v1  ;;  %v449_v3 = vld [vmem:[%s438_s6] sm:$0x1] (!%p1102_p13)  ;;  %v452_v5 = vld [vmem:[#allocation7] sm:$0x1] (!%p1102_p13) }
  0xef   : > { %1224 = vmatpush3.bf16.xpose.msra.mxu0 (!%p1102_p13), %v458_v2  ;;  %v450_v4 = vpack.c.bf16 (!%p1102_p13), %v449_v3, %v449_v3  ;;  %vm505_vm2 = vcmask (!%p1102_p13), 57344   ;;  %s1810_s17 = smov (!%p1102_p13), 125   ;;  %s1811_s25 = smov (!%p1102_p13), 127   ;;  %v508_v23 = vld [vmem:[%s2218_s23] sm:$0xf] (!%p1102_p13) }
  0xf0   : > { %s1812_s21 = smov (!%p1102_p13), 124   ;;  %s1813_s4 = smov (!%p1102_p13), 126   ;;  %v1104_v24 = vld [vmem:[%s2218_s23 + $0x4] sm:$0xf] (!%p1102_p13)  ;;  %v509_v25 = vunpack.c.l.bf16 (!%p1102_p13), %v508_v23  ;;  %v1105_v28 = vld [vmem:[%s2218_s23 + $0x8] sm:$0xf] (!%p1102_p13) }
  0xf1   : > { %s1814_s11 = smov (!%p1102_p13), 122   ;;  %s1815_s19 = smov (!%p1102_p13), 123   ;;  %v518_v27 = vunpack.c.l.bf16 (!%p1102_p13), %v1104_v24  ;;  %v1106_v32 = vld [vmem:[%s2218_s23 + $0xc] sm:$0xf] (!%p1102_p13)  ;;  %v528_v34 = vunpack.c.l.bf16 (!%p1102_p13), %v1105_v28  ;;  %v1107_v35 = vld [vmem:[%s2218_s23 + $0x10] sm:$0xf] (!%p1102_p13) }
  0xf2   : > { %s1816_s24 = smov (!%p1102_p13), 121   ;;  %s2471_s18 = scalar_lea.vmem (!%p1102_p13), [#allocation10], %s2224_s27  ;;  %v538_v37 = vunpack.c.l.bf16 (!%p1102_p13), %v1106_v32  ;;  %v1108_v39 = vld [vmem:[%s2218_s23 + $0x14] sm:$0xf] (!%p1102_p13)  ;;  %v548_v43 = vunpack.c.l.bf16 (!%p1102_p13), %v1107_v35  ;;  %v1109_v45 = vld [vmem:[%s2218_s23 + $0x18] sm:$0xf] (!%p1102_p13) }
  0xf3   : > { %v507_v30 = vld [vmem:[%s2471_s18] sm:$0xff] (!%p1102_p13)  ;;  %v558_v48 = vunpack.c.l.bf16 (!%p1102_p13), %v1108_v39  ;;  %v1110_v50 = vld [vmem:[%s2218_s23 + $0x1c] sm:$0xf] (!%p1102_p13)  ;;  %v568_v53 = vunpack.c.l.bf16 (!%p1102_p13), %v1109_v45 }
  0xf4   : > { %v578_v57 = vunpack.c.l.bf16 (!%p1102_p13), %v1110_v50 }
  0xf6   : > { %1226 = vmatmul.mubr.msk.bf16.vlgmr.msra.gmra.mrb[0].mxu0 %vm453_vm0, %v450_v4 }
 0x1c9   : > { %v494_v6 = vpop.f32.mrb[0].mxu0 }
 0x1ca   : > { %v495_v7 = vadd.f32 %v494_v6, %v452_v5  ;;  %v1227_v8 = vpop.f32.mrb[1].mxu0 }
 0x1cb   : > { %v497_v9 = vpop.f32.mrb[2].mxu0 }
 0x1cc   : > { %v501_v10 = vmul.f32 0.70710677, %v495_v7  ;;  %v1228_v11 = vpop.f32.mrb[3].mxu0  ;;  %v500_v13 = vmul.f32 0.5, %v495_v7 }
 0x1ce   : > { %1466 = verf.f32 %v501_v10 }
 0x1d8   : > { %v1467_v12 = vpop.eup %1466 }
 0x1d9   : > { %v503_v14 = vadd.f32 1.0, %v1467_v12 }
 0x1db   : > { %v504_v15 = vmul.f32 %v503_v14, %v500_v13 }
 0x1dd   : > { %506 = vst.msk [vmem:[#allocation2] sm:$0x1] %vm505_vm2, %v504_v15  ;;  %539 = vrot.lane.b32.xlu1 %v504_v15, %s1810_s17  ;;  %519 = vrot.lane.b32.xlu0 %v504_v15, %s1811_s25 }
 0x1de   : > { %1251 = vpush %v504_v15 }
 0x1e1   : > { %549 = vrot.lane.b32.xlu1 %v504_v15, %s1812_s21  ;;  %529 = vrot.lane.b32.xlu0 %v504_v15, %s1813_s4 }
 0x1e5   : > { %569 = vrot.lane.b32.xlu1 %v504_v15, %s1814_s11  ;;  %559 = vrot.lane.b32.xlu0 %v504_v15, %s1815_s19 }
 0x1e9   : > { %579 = vrot.lane.b32.xlu0 %v504_v15, %s1816_s24 }
 0x20f   : > { %s1252_s10 = spop %1251 }
 0x210   : > { %v512_v26 = vstv %s1252_s10 }
 0x211   : > { %v514_v29 = vmul.f32 %v512_v26, %v509_v25 }
 0x213   : > { %v515_v36 = vadd.f32 %v514_v29, %v507_v30 }
 0x24f   : > { %v540_v16 = vpop.permute.xlu1 %539  ;;  %v520_v17 = vpop.permute.xlu0 %519 }
 0x250   : > { %1253 = vpush %v520_v17 }
 0x253   : > { %v550_v18 = vpop.permute.xlu1 %549  ;;  %v530_v19 = vpop.permute.xlu0 %529 }
 0x254   : > { %1255 = vpush %v530_v19 }
 0x255   : > { %1257 = vpush %v540_v16 }
 0x256   : > { %1259 = vpush %v550_v18 }
 0x257   : > { %v570_v20 = vpop.permute.xlu1 %569  ;;  %v560_v21 = vpop.permute.xlu0 %559 }
 0x258   : > { %1261 = vpush %v560_v21 }
 0x259   : > { %1263 = vpush %v570_v20 }
 0x25b   : > { %v580_v22 = vpop.permute.xlu0 %579 }
 0x25c   : > { %1265 = vpush %v580_v22 }
 0x281   : > { %s1254_s6 = spop %1253 }
 0x282   : > { %v522_v31 = vstv %s1254_s6 }
 0x283   : > { %v524_v33 = vmul.f32 %v522_v31, %v518_v27 }
 0x285   : > { %s1256_s7 = spop %1255  ;;  %v525_v40 = vadd.f32 %v524_v33, %v515_v36 }
 0x286   : > { %v532_v38 = vstv %s1256_s7  ;;  %s1258_s20 = spop %1257 }
 0x287   : > { %v534_v41 = vmul.f32 %v532_v38, %v528_v34  ;;  %v542_v42 = vstv %s1258_s20  ;;  %s1260_s1 = spop %1259 }
 0x288   : > { %v552_v44 = vstv %s1260_s1  ;;  %v544_v47 = vmul.f32 %v542_v42, %v538_v37 }
 0x289   : > { %v535_v46 = vadd.f32 %v534_v41, %v525_v40  ;;  %s1262_s27 = spop %1261  ;;  %v554_v52 = vmul.f32 %v552_v44, %v548_v43 }
 0x28a   : > { %v562_v49 = vstv %s1262_s27  ;;  %s1264_s17 = spop %1263 }
 0x28b   : > { %v545_v51 = vadd.f32 %v544_v47, %v535_v46  ;;  %v572_v54 = vstv %s1264_s17  ;;  %v564_v56 = vmul.f32 %v562_v49, %v558_v48 }
 0x28c   : > { %v574_v60 = vmul.f32 %v572_v54, %v568_v53 }
 0x28d   : > { %v555_v55 = vadd.f32 %v554_v52, %v545_v51  ;;  %s1266_s25 = spop %1265 }
 0x28e   : > { %v582_v58 = vstv %s1266_s25 }
 0x28f   : > { %v565_v59 = vadd.f32 %v564_v56, %v555_v55  ;;  %v584_v62 = vmul.f32 %v582_v58, %v578_v57 }
 0x291   : > { %v575_v61 = vadd.f32 %v574_v60, %v565_v59 }
 0x293   : > { %v585_v63 = vadd.f32 %v584_v62, %v575_v61 }
 0x295   : > { %v586_v0 = vpack.c.bf16 %v585_v63, %v585_v63 }
 0x297   : > { %587 = vst [vmem:[#allocation3] sm:$0xf] %v586_v0 }
 0x298 PF: > { %v1111_v1 = vld [vmem:[#allocation2] ss:$0 sm:$0xff]  ;;  %v1817_v2 = vmov 2   ;;  %v1818_v3 = vmov 0   ;;  %v1819_v4 = vmov 3   ;;  %v1820_v5 = vmov 1  }
 0x299   : > { %1470 = vset.pattern.permute.xlu1 %v1817_v2  ;;  %1468 = vset.pattern.permute.xlu0 %v1818_v3  ;;  %v1821_v6 = vmov 4   ;;  %v1822_v7 = vmov 5   ;;  %v1823_v8 = vmov 6   ;;  %v1824_v9 = vmov 7   ;;  %v590_v11 = vld [vmem:[%s2228_s12] sm:$0xff]   ;;  %v1113_v15 = vld [vmem:[%s2228_s12 + $0x8] sm:$0xff]  }
 0x29a   : > { %616 = vperm.xlu1 %1470, %v1111_v1   ;;  %598 = vperm.xlu0 %1468, %v1111_v1   ;;  %v591_v12 = vunpack.c.l.bf16 %v590_v11  ;;  %v605_v17 = vunpack.c.h.bf16 %v590_v11  ;;  %v589_v18 = vld [vmem:[%s2247_s2] sm:$0xff]  ;;  %v614_v19 = vunpack.c.l.bf16 %v1113_v15  ;;  %v623_v20 = vunpack.c.h.bf16 %v1113_v15  ;;  %v1115_v21 = vld [vmem:[%s2228_s12 + $0x10] ss:$12 sps:$4 sm:$0xff]   ;;  %v1116_v30 = vld [vmem:[%s2228_s12 + $0x14] sm:$0xff]   ;;  %s2472_s23 = sld [smem:[#allocation21_spill]]  ;;  %s2473_s2 = sld [smem:[#allocation22_spill]] }
 0x29b   : > { %v632_v26 = vunpack.c.l.bf16 %v1115_v21  ;;  %v641_v34 = vunpack.c.l.bf16 %v1116_v30  ;;  %v650_v37 = vunpack.c.h.bf16 %v1116_v30  ;;  %vm684_vm3 = vcmask 64512   ;;  %s2474_s12 = sld [smem:[#allocation20_spill]]  ;;  %s2476_s6 = sld [smem:[#allocation25_spill]] }
 0x29c   : > { %v659_v44 = vunpack.c.h.bf16 %v1115_v21  ;;  %vm709_vm4 = vcmask 1043456   ;;  %s908_s18 = sshll.u32 %s2249_s5, 4  ;;  %s2477_s1 = sld [smem:[#allocation36_spill]]  ;;  %s2290_s18 = int_to_ptr.vmem [resolvable:$true] %s908_s18 }
 0x29d   : > { %s2296_s17 = scalar_lea.sflag [#allocation6], %s433_s3  ;;  %s1623_s25 = scalar_lea.vmem %s2290_s18, 1024 }
 0x29e   : > { %1471 = vset.pattern.permute.xlu1 %v1819_v4  ;;  %1469 = vset.pattern.permute.xlu0 %v1820_v5  ;;  %v666_v10 = vld [vmem:[#allocation3] sm:$0xf]  ;;  %p1624_p0 = scmp.ne.s32.totalorder %s2290_s18, %s1623_s25 }
 0x29f   : > { %625 = vperm.xlu1 %1471, %v1111_v1   ;;  %607 = vperm.xlu0 %1469, %v1111_v1  }
 0x2a0   : > { %s1267_s21 = smul.u32 48, %s2472_s23  ;;  %s1825_s23 = smov [#allocation12]  }
 0x2a1   : > { %s1268_s4 = smul.u32 96, %s2473_s2  ;;  %p2478_p8 = scmp.ne.s32.totalorder %s2476_s6, 0 }
 0x2a2   : > { %s903_s11 = sadd.s32 %s2474_s12, %s1267_s21  ;;  %s1627_s2 = sshll.u32 %s1825_s23, 4  ;;  %s1628_s2 = int_to_ptr.vmem [resolvable:$false] %s1627_s2 }
 0x2a3   : > { %1472 = vset.pattern.permute.xlu1 %v1821_v6  ;;  %1473 = vset.pattern.permute.xlu0 %v1822_v7  ;;  %s905_s19 = sadd.s32 %s1268_s4, %s903_s11  ;;  %p1625_p9 = pnand %p1624_p0, %p2478_p8 }
 0x2a4   : > { %634 = vperm.xlu1 %1472, %v1111_v1   ;;  %643 = vperm.xlu0 %1473, %v1111_v1   ;;  %s1146_s10 = sshll.u32 %s905_s19, 6  ;;  %s1629_s12 = scalar_lea.vmem %s1628_s2, 2048 }
 0x2a5   : > { %s2288_s27 = scalar_lea.hbm %s2477_s1, %s1146_s10  ;;  %p1626_p1 = pneg %p1625_p9 }
 0x2a6   : > { %p1630_p7 = scmp.lt.s32.totalorder %s2290_s18, %s1628_s2  ;;  %p1631_p12 = scmp.lt.s32.totalorder %s1629_s12, %s1623_s25 }
 0x2a8   : > { %1474 = vset.pattern.permute.xlu1 %v1823_v8  ;;  %p1632_p4 = por %p1631_p12, %p1630_p7 }
 0x2a9   : > { %652 = vperm.xlu1 %1474, %v1111_v1  }
 0x2aa   : > { %p1633_p10 = pnand %p1632_p4, %p1626_p1 }
 0x2ad   : > { %1475 = vset.pattern.permute.xlu1 %v1824_v9 }
 0x2ae   : > { %661 = vperm.xlu1 %1475, %v1111_v1  }
 0x2c2   : > { %668 = vxpose.xlu0.c.b16.start.end [1/1] (short) %v666_v10, 128 }
 0x2cb   : > { %1476 = vset.pattern.permute.xlu0 %v1824_v9 }
 0x319   : > { %v599_v13 = vpop.permute.xlu0 %598  ;;  %v617_v14 = vpop.permute.xlu1 %616 }
 0x31a   : > { %v601_v16 = vmul.f32 %v599_v13, %v591_v12  ;;  %v619_v27 = vmul.f32 %v617_v14, %v614_v19 }
 0x31c   : > { %v602_v24 = vadd.f32 %v601_v16, %v589_v18 }
 0x31e   : > { %v608_v22 = vpop.permute.xlu0 %607  ;;  %v626_v23 = vpop.permute.xlu1 %625 }
 0x31f   : > { %v610_v25 = vmul.f32 %v608_v22, %v605_v17  ;;  %v628_v29 = vmul.f32 %v626_v23, %v623_v20 }
 0x321   : > { %v611_v28 = vadd.f32 %v610_v25, %v602_v24 }
 0x323   : > { %v620_v31 = vadd.f32 %v619_v27, %v611_v28  ;;  %v644_v32 = vpop.permute.xlu0 %643  ;;  %v635_v33 = vpop.permute.xlu1 %634 }
 0x324   : > { %v637_v35 = vmul.f32 %v635_v33, %v632_v26  ;;  %v646_v39 = vmul.f32 %v644_v32, %v641_v34 }
 0x325   : > { %v629_v36 = vadd.f32 %v628_v29, %v620_v31 }
 0x327   : > { %v638_v38 = vadd.f32 %v637_v35, %v629_v36 }
 0x328   : > { %v653_v40 = vpop.permute.xlu1 %652  ;;  %v676_v41 = vpop.trf.xlu0 }
 0x329   : > { %1231 = vmatprep.mubr.msk.bf16.mxu0 %vm684_vm3, %v676_v41  ;;  %v647_v42 = vadd.f32 %v646_v39, %v638_v38  ;;  %v655_v43 = vmul.f32 %v653_v40, %v650_v37 }
 0x32b   : > { %v656_v47 = vadd.f32 %v655_v43, %v647_v42 }
 0x32c   : > { %v677_v45 = vpop.trf.xlu0 }
 0x32d   : > { %v662_v46 = vpop.permute.xlu1 %661 }
 0x32e   : > { %v664_v48 = vmul.f32 %v662_v46, %v659_v44 }
 0x330   : > { %v665_v49 = vadd.f32 %v664_v48, %v656_v47  ;;  %v678_v50 = vpop.trf.xlu0 }
 0x332   : > { %v667_v51 = vpack.c.bf16 %v665_v49, %v665_v49 }
 0x334   : > { %1249 = vmatprep.subr.msk.bf16.mxu0 %vm709_vm4, %v667_v51  ;;  %1250 = vmatprep.subr.msk.bf16.mxu1 %vm709_vm4, %v667_v51  ;;  %v679_v52 = vpop.trf.xlu0  ;;  %v711_v53 = vsel %vm709_vm4, %v667_v51, 0 }
 0x335   : > { %1230 = vmatpush3.bf16.msra.mxu0 %v711_v53  ;;  %1248 = vmatpush3.bf16.msra.mxu1 %v711_v53 }
 0x338   : > { %1232 = vmatmul.mubr.msk.bf16.vlgmr.msra.gmra.mrb[0].mxu0 %vm684_vm3, %v677_v45  ;;  %v680_v54 = vpop.trf.xlu0 }
 0x339   : > { %1235 = vmatprep.mubr.msk.bf16.mxu0 %vm684_vm3, %v678_v50  ;;  %1239 = vmatprep.mubr.msk.bf16.mxu1 %vm684_vm3, %v680_v54 }
 0x33c   : > { %v681_v55 = vpop.trf.xlu0 }
 0x33d   : > { %1240 = vmatmul.mubr.msk.bf16.vlgmr.msra.gmra.mrb[0].mxu1 %vm684_vm3, %v681_v55 }
 0x340   : > { %1236 = vmatmul.mubr.msk.bf16.gmra.mrb[4].mxu0 %vm684_vm3, %v679_v52  ;;  %v682_v56 = vpop.trf.xlu0 }
 0x341   : > { %1243 = vmatprep.mubr.msk.bf16.mxu1 %vm684_vm3, %v682_v56 }
 0x344   : > { %v683_v57 = vpop.trf.xlu0 }
 0x345   : > { %1244 = vmatmul.mubr.msk.bf16.gmra.mrb[4].mxu1 %vm684_vm3, %v683_v57 }
 0x40b   : > { %v1233_v58 = vpop.f32.mrb[0].mxu0 }
 0x40c   : > { %v747_v59 = vpop.f32.mrb[1].mxu0 }
 0x40d   : > { %v1234_v60 = vpop.f32.mrb[2].mxu0 }
 0x40e   : > { %v1173_v61 = vpack.c.bf16 %v1234_v60, %v1233_v58  ;;  %v750_v62 = vpop.f32.mrb[3].mxu0 }
 0x40f   : > { %v1168_v63 = vpack.c.bf16 %v750_v62, %v747_v59 }
 0x410   : > { %1205 = vst [vmem:[%s2249_s5 + $0x8] sm:$0xff] %v1173_v61   ;;  %v1241_v0 = vpop.f32.mrb[0].mxu1 }
 0x411   : > { %1169 = vst [vmem:[%s2249_s5] sm:$0xff] %v1168_v63   ;;  %v779_v1 = vpop.f32.mrb[1].mxu1 }
 0x412   : > { %v1242_v2 = vpop.f32.mrb[2].mxu1 }
 0x413   : > { %v1193_v3 = vpack.c.bf16 %v1242_v2, %v1241_v0  ;;  %v1237_v4 = vpop.f32.mrb[4].mxu0  ;;  %v782_v5 = vpop.f32.mrb[3].mxu1 }
 0x414   : > { %v1188_v6 = vpack.c.bf16 %v782_v5, %v779_v1  ;;  %v763_v7 = vpop.f32.mrb[5].mxu0 }
 0x415   : > { %1209 = vst [vmem:[%s2249_s5 + $0x28] sm:$0xff] %v1193_v3   ;;  %v1238_v8 = vpop.f32.mrb[6].mxu0 }
 0x416   : > { %1208 = vst [vmem:[%s2249_s5 + $0x20] sm:$0xff] %v1188_v6   ;;  %v1183_v9 = vpack.c.bf16 %v1238_v8, %v1237_v4  ;;  %v766_v10 = vpop.f32.mrb[7].mxu0 }
 0x417   : > { %v1178_v11 = vpack.c.bf16 %v766_v10, %v763_v7 }
 0x418   : > { %1207 = vst [vmem:[%s2249_s5 + $0x18] sm:$0xff] %v1183_v9   ;;  %v1245_v12 = vpop.f32.mrb[4].mxu1 }
 0x419   : > { %1206 = vst [vmem:[%s2249_s5 + $0x10] sm:$0xff] %v1178_v11   ;;  %v795_v13 = vpop.f32.mrb[5].mxu1 }
 0x41a   : > { %v1246_v14 = vpop.f32.mrb[6].mxu1 }
 0x41b   : > { %v1203_v15 = vpack.c.bf16 %v1246_v14, %v1245_v12  ;;  %v798_v16 = vpop.f32.mrb[7].mxu1 }
 0x41c   : > { %v1198_v17 = vpack.c.bf16 %v798_v16, %v795_v13 }
 0x41d   : > { %1211 = vst [vmem:[%s2249_s5 + $0x38] sm:$0xff] %v1203_v15  }
 0x41e   : > { %1210 = vst [vmem:[%s2249_s5 + $0x30] sm:$0xff] %v1198_v17  }
 0x41f   : > { %1636 = shalt.err (!%p1633_p10)
}
 0x420   : > { %s1637_s5 = scalar_lea.hbm %s2288_s27, 1024  ;;  %s1641_s4 = scalar_lea.hbm %s2477_s1, 12288 }
 0x421   : > { %p1638_p11 = scmp.ne.s32.totalorder %s2288_s27, %s1637_s5  ;;  %p1642_p5 = scmp.lt.u32.totalorder %s2288_s27, %s2477_s1 }
 0x422   : > { %p1643_p6 = scmp.lt.u32.totalorder %s1641_s4, %s1637_s5  ;;  %p1645_p0 = scmp.lt.u32.totalorder %s1637_s5, %s2288_s27 }
 0x423   : > { %p1639_p2 = pnand %p1638_p11, %p2478_p8 }
 0x424   : > { %p1644_p13 = por %p1643_p6, %p1642_p5 }
 0x425   : > { %p1640_p3 = pneg %p1639_p2 }
 0x426   : > { %p1646_p9 = por %p1645_p0, %p1644_p13 }
 0x428   : > { %p1647_p1 = pnand %p1646_p9, %p1640_p3 }
 0x42a   : > { %1650 = shalt.err (!%p1647_p1)
}
 0x42b   : > { %s1826_s24 = smov 64   ;;  %s1827_s10 = smov 192  }
 0x42c   : > { %s1828_s7 = smov 4  }
 0x42d   : > { %1283 = dma.vmem_to_hbm [thread:$0]  (%p2478_p8), %s2290_s18, 1024, %s2288_s27, %s2296_s17, %s1826_s24, %s1827_s10, %s1828_s7  }
 0x42e PF: > { %s2479_s20 = sld [smem:[#allocation23_spill]]  ;;  %s2480_s25 = sld [smem:[#allocation18_spill]] }
 0x42f   : > { %s2481_s23 = sld [smem:[#allocation26_spill]] }
 0x434   : > { %p1311_p7 = scmp.ge.s32.totalorder %s2479_s20, 2  ;;  %s923_s2 = sand.u32 1, %s2480_s25  }
 0x435   : > { %p2482_p12 = scmp.ne.s32.totalorder %s2481_s23, 0  ;;  %s924_s12 = scalar_lea.sflag [#allocation6], %s923_s2 }
 0x437   : > { %p1303_p4 = pnand %p1311_p7, %p2482_p12 }
 0x439   : > { %1732 = dma.done.wait (!%p1303_p4), %s924_s12, 1024  }
 0x43a   : > { %1734 = vsyncadd (!%p1303_p4), %s924_s12, 4294966272  ;;  %s22_s5 = sadd.s32 1, %s2479_s20   ;;  %s2484_s24 = sld [smem:[#allocation19_spill]] }
 0x43b   : > { %p2325_p10 = scmp.ge.s32.totalorder %s22_s5, 14   ;;  %s2485_s6 = smov %s2504_s30 }
 0x43c   : > { %s2486_s18 = sld [smem:[#allocation27_spill]]  ;;  %s2487_s17 = sld [smem:[#allocation28_spill]] }
 0x43d   : > { %s2488_s25 = smov %s1745_s26  ;;  %s2489_s26 = smov %s2204_s22 }
 0x43e   : > { %s2490_s27 = smov %s1753_s28  ;;  %s2491_s28 = smov %s1757_s29 }
 0x43f   : > { %s2492_s29 = smov %s2153_s0  ;;  %s2493_s30 = smov %s1765_s8 }
 0x440   : > { %s2494_s8 = smov %s1769_s9  ;;  %s2495_s9 = smov %s2160_s16 }
 0x441   : > { %s2496_s10 = smov %s1785_s13  ;;  %s2497_s11 = smov %s1789_s14 }
 0x442   : > { %s2498_s12 = smov %s1793_s15  ;;  %s2499_s13 = smov %s2485_s6 }
 0x443   : > { %s2500_s14 = smov %s2486_s18  ;;  %s2501_s15 = smov %s2487_s17 }
 0x444   : > { %s2502_s16 = smov %s22_s5  ;;  %21 = sbr.rel (!%p2325_p10) target bundleno = 20 (0x14), region = 146 }
 0x44b   :  { %929 = vsyncpa [#allocation5], 1 }
 0x44c   :  { %931 = vsyncpa [#allocation5 + $0x1], 1 }
 0x44d   :  { %932 = vsyncpa [#allocation8], 1 }
 0x44e   :  { %933 = vsyncpa [#allocation6], 1 }
 0x44f   :  { %935 = vsyncpa [#allocation6 + $0x1], 1 }

</bundles_post_ra>
